<compile_context>
chip_gen: v7x
topology: tpu7x:2x2x1
jax: 0.10.0
libtpu: 0.0.40
codegen_flags: <defaults>
</compile_context>

<pallas_src>
import functools

import jax
import jax.numpy as jnp
from jax.experimental import pallas as pl
from jax.experimental.pallas import tpu as pltpu


def _round_up(x, m):
    return ((x + m - 1) // m) * m


def _mlp_kernel(x_ref, w_ref, b_ref, o_ref, *, row_offs, k_dims, n_dims):
    """Full forward chain on one batch tile.

    x_ref : (TILE_M, K0)        f32
    w_ref : (sum(K_pad), max_N) bf16  -- all layers packed row-wise, zero padded
    b_ref : (8, max_N)          f32   -- row l = bias of layer l, zero padded
    o_ref : (TILE_M, N_last)    f32   -- lane-dense padded output
    """
    h = x_ref[...]                       # f32 activations
    biases = b_ref[...]                  # load the tiny bias slab once
    n_layers = len(k_dims)
    for l in range(n_layers):
        r0, k, n = row_offs[l], k_dims[l], n_dims[l]
        w = w_ref[r0:r0 + k, 0:n]        # bf16 (k, n), static aligned slice
        acc = jnp.dot(h.astype(jnp.bfloat16), w,
                      preferred_element_type=jnp.float32)
        acc = acc + biases[l:l + 1, 0:n]            # f32 bias add
        if l < n_layers - 1:
            acc = jnp.maximum(acc, 0.0)             # f32 ReLU (not on output)
        h = acc
    o_ref[...] = h.astype(o_ref.dtype)


def pack_params(params, dim_in, dim_out):
    """Pack the 6 (in,out) f32 weights / biases into one bf16 weight slab and
    one f32 bias slab, zero-padded to lane/sublane friendly sizes."""
    names = ["1", "2", "3", "4", "5", "o"]
    out_dims = [300, 200, 100, 50, 10, dim_out]

    n_pad = [_round_up(n, 128) for n in out_dims]        # padded output widths
    k_pad = [_round_up(dim_in, 8)] + n_pad[:-1]          # padded input widths
    max_n = max(n_pad)

    row_offs, rows = [], 0
    for k in k_pad:
        row_offs.append(rows)
        rows += k

    w_slab = jnp.zeros((rows, max_n), jnp.float32)
    b_slab = jnp.zeros((8, max_n), jnp.float32)
    for i, name in enumerate(names):
        w = params[f"w{name}"]                        # (in, out) f32
        b = params[f"b{name}"].reshape(-1)            # (out,)   f32
        w_slab = w_slab.at[row_offs[i]:row_offs[i] + w.shape[0],
                           0:w.shape[1]].set(w)
        b_slab = b_slab.at[i, 0:b.shape[0]].set(b)
    w_slab = w_slab.astype(jnp.bfloat16)

    meta = dict(row_offs=tuple(row_offs), k_dims=tuple(k_pad),
                n_dims=tuple(n_pad))
    return w_slab, b_slab, meta


def compressed_mlp_forward(x_nchw, packed, dim_out, *, tile_m=512):
    """x_nchw: (B, C, H, W) f32.  packed: output of pack_params."""
    w_slab, b_slab, meta = packed
    B = x_nchw.shape[0]
    dim_in = x_nchw.shape[1] * x_nchw.shape[2] * x_nchw.shape[3]
    x_flat = x_nchw.reshape(B, dim_in).astype(jnp.float32)

    k0 = meta["k_dims"][0]
    n_last = meta["n_dims"][-1]

    # M tile: multiple of 8 at minimum, capped so small batches don't over-pad.
    tile_m = min(tile_m, _round_up(B, 8))
    b_pad = _round_up(B, tile_m)

    x_p = jnp.zeros((b_pad, k0), jnp.float32).at[:B, :dim_in].set(x_flat)

    grid = (b_pad // tile_m,)

    kernel = functools.partial(_mlp_kernel,
                               row_offs=meta["row_offs"],
                               k_dims=meta["k_dims"],
                               n_dims=meta["n_dims"])

    flops = 2 * b_pad * sum(k * n for k, n in zip(meta["k_dims"],
                                                  meta["n_dims"]))
    bytes_accessed = (x_p.size * 4 + w_slab.size * 2 + b_slab.size * 4
                      + b_pad * n_last * 4)

    out_p = pl.pallas_call(
        kernel,
        out_shape=jax.ShapeDtypeStruct((b_pad, n_last), jnp.float32),
        grid=grid,
        in_specs=[
            pl.BlockSpec((tile_m, k0), lambda i: (i, 0)),        # x tile
            pl.BlockSpec(w_slab.shape, lambda i: (0, 0)),        # resident W
            pl.BlockSpec(b_slab.shape, lambda i: (0, 0)),        # resident b
        ],
        out_specs=pl.BlockSpec((tile_m, n_last), lambda i: (i, 0)),
        compiler_params=pltpu.CompilerParams(
            dimension_semantics=("parallel",),
            vmem_limit_bytes=32 * 1024 * 1024),
        cost_estimate=pl.CostEstimate(flops=flops, transcendentals=0,
                                      bytes_accessed=bytes_accessed),
    )(x_p, w_slab, b_slab)

    return out_p[:B, :dim_out]


def init_params(key, dim_in, dim_out):
    """PyTorch-Linear-style init U(-1/sqrt(fan_in), 1/sqrt(fan_in)).
    Weights stored as (in, out) (transposed vs torch), biases as (1, out).
    Layer sizes match CompressedMLP_real_bad: dim_in->300->200->100->50->10->dim_out."""
    sizes = [(dim_in, 300), (300, 200), (200, 100), (100, 50), (50, 10),
             (10, dim_out)]
    names = ["1", "2", "3", "4", "5", "o"]
    params = {}
    for (fan_in, fan_out), name in zip(sizes, names):
        key, kw, kb = jax.random.split(key, 3)
        bound = 1.0 / (fan_in ** 0.5)
        params[f"w{name}"] = jax.random.uniform(
            kw, (fan_in, fan_out), jnp.float32, minval=-bound, maxval=bound)
        params[f"b{name}"] = jax.random.uniform(
            kb, (1, fan_out), jnp.float32, minval=-bound, maxval=bound)
    return params


def reference_forward(x_nchw, params):
    """Plain-JAX reference using the same bf16 weight / activation quantization
    as the kernel (f32 accumulation, f32 bias add + ReLU)."""
    B = x_nchw.shape[0]
    h = x_nchw.reshape(B, -1).astype(jnp.float32)
    for name in ["1", "2", "3", "4", "5", "o"]:
        w = params[f"w{name}"].astype(jnp.bfloat16)
        acc = jnp.dot(h.astype(jnp.bfloat16), w,
                      preferred_element_type=jnp.float32)
        acc = acc + params[f"b{name}"]
        h = jnp.maximum(acc, 0.0) if name != "o" else acc
    return h


if __name__ == "__main__":
    key = jax.random.PRNGKey(0)
    key, kx, kp = jax.random.split(key, 3)

    # FMNIST-like input: batch=2, 1 channel, 28x28 -> dim_in = 784, dim_out = 10
    B, C, H, W = 2, 1, 28, 28
    dim_in, dim_out = C * H * W, 10

    x = jax.random.normal(kx, (B, C, H, W), jnp.float32)
    params = init_params(kp, dim_in, dim_out)
    packed = pack_params(params, dim_in, dim_out)

    out = compressed_mlp_forward(x, packed, dim_out)
    out = jax.block_until_ready(out)

    ref = reference_forward(x, params)
    assert out.shape == (B, dim_out)
    assert jnp.allclose(out, ref, atol=1e-3, rtol=1e-3), "mismatch vs reference"

    print("KERNEL_OK")
</pallas_src>

<mosaic_0001>
module attributes {stable_mosaic.version = 11 : i64} {
  func.func @_mlp_kernel(%arg0: i32, %arg1: memref<8x784xf32, #tpu.memory_space<vmem>>, %arg2: memref<1808x384xbf16, #tpu.memory_space<vmem>>, %arg3: memref<8x384xf32, #tpu.memory_space<vmem>>, %arg4: memref<8x128xf32, #tpu.memory_space<vmem>>) attributes {dimension_semantics = [#tpu.dimension_semantics<parallel>], iteration_bounds = array<i64: 1>, scalar_prefetch = 0 : i64, scratch_operands = 0 : i64, tpu.core_type = #tpu.core_type<tc>, window_params = [{transform_indices = @transform_0, window_bounds = array<i64: 8, 784>}, {pipeline_mode = #tpu.pipeline_mode<synchronous>, transform_indices = @transform_1, window_bounds = array<i64: 1808, 384>}, {pipeline_mode = #tpu.pipeline_mode<synchronous>, transform_indices = @transform_2, window_bounds = array<i64: 8, 384>}, {transform_indices = @transform_3, window_bounds = array<i64: 8, 128>}]} {
    %c0 = arith.constant 0 : index
    %c0_0 = arith.constant 0 : index
    %0 = vector.load %arg1[%c0, %c0_0] : memref<8x784xf32, #tpu.memory_space<vmem>>, vector<8x784xf32>
    %c0_1 = arith.constant 0 : index
    %c0_2 = arith.constant 0 : index
    %1 = vector.load %arg3[%c0_1, %c0_2] : memref<8x384xf32, #tpu.memory_space<vmem>>, vector<8x384xf32>
    %c0_3 = arith.constant 0 : index
    %c0_4 = arith.constant 0 : index
    %2 = vector.load %arg2[%c0_3, %c0_4] : memref<1808x384xbf16, #tpu.memory_space<vmem>>, vector<784x384xbf16>
    %3 = arith.truncf %0 : vector<8x784xf32> to vector<8x784xbf16>
    %cst = arith.constant dense<0.000000e+00> : vector<8x384xf32>
    %4 = tpu.matmul %3, %2, %cst {dimension_numbers = #tpu.dot_dimension_numbers<[1], [0], [0], [1], [0, 0, 1, 1], [], []>} : vector<8x784xbf16>, vector<784x384xbf16>, vector<8x384xf32> -> vector<8x384xf32>
    %5 = vector.extract_strided_slice %1 {offsets = [0, 0], sizes = [1, 384], strides = [1, 1]} : vector<8x384xf32> to vector<1x384xf32>
    %6 = vector.broadcast %5 : vector<1x384xf32> to vector<8x384xf32>
    %7 = arith.addf %4, %6 : vector<8x384xf32>
    %cst_5 = arith.constant 0.000000e+00 : f32
    %8 = vector.broadcast %cst_5 : f32 to vector<8x384xf32>
    %9 = arith.maximumf %7, %8 : vector<8x384xf32>
    %c784 = arith.constant 784 : index
    %c0_6 = arith.constant 0 : index
    %10 = vector.load %arg2[%c784, %c0_6] : memref<1808x384xbf16, #tpu.memory_space<vmem>>, vector<384x256xbf16>
    %11 = arith.truncf %9 : vector<8x384xf32> to vector<8x384xbf16>
    %cst_7 = arith.constant dense<0.000000e+00> : vector<8x256xf32>
    %12 = tpu.matmul %11, %10, %cst_7 {dimension_numbers = #tpu.dot_dimension_numbers<[1], [0], [0], [1], [0, 0, 1, 1], [], []>} : vector<8x384xbf16>, vector<384x256xbf16>, vector<8x256xf32> -> vector<8x256xf32>
    %13 = vector.extract_strided_slice %1 {offsets = [1, 0], sizes = [1, 256], strides = [1, 1]} : vector<8x384xf32> to vector<1x256xf32>
    %14 = vector.broadcast %13 : vector<1x256xf32> to vector<8x256xf32>
    %15 = arith.addf %12, %14 : vector<8x256xf32>
    %cst_8 = arith.constant 0.000000e+00 : f32
    %16 = vector.broadcast %cst_8 : f32 to vector<8x256xf32>
    %17 = arith.maximumf %15, %16 : vector<8x256xf32>
    %c1168 = arith.constant 1168 : index
    %c0_9 = arith.constant 0 : index
    %18 = vector.load %arg2[%c1168, %c0_9] : memref<1808x384xbf16, #tpu.memory_space<vmem>>, vector<256x128xbf16>
    %19 = arith.truncf %17 : vector<8x256xf32> to vector<8x256xbf16>
    %cst_10 = arith.constant dense<0.000000e+00> : vector<8x128xf32>
    %20 = tpu.matmul %19, %18, %cst_10 {dimension_numbers = #tpu.dot_dimension_numbers<[1], [0], [0], [1], [0, 0, 1, 1], [], []>} : vector<8x256xbf16>, vector<256x128xbf16>, vector<8x128xf32> -> vector<8x128xf32>
    %21 = vector.extract_strided_slice %1 {offsets = [2, 0], sizes = [1, 128], strides = [1, 1]} : vector<8x384xf32> to vector<1x128xf32>
    %22 = vector.broadcast %21 : vector<1x128xf32> to vector<8x128xf32>
    %23 = arith.addf %20, %22 : vector<8x128xf32>
    %cst_11 = arith.constant 0.000000e+00 : f32
    %24 = vector.broadcast %cst_11 : f32 to vector<8x128xf32>
    %25 = arith.maximumf %23, %24 : vector<8x128xf32>
    %c1424 = arith.constant 1424 : index
    %c0_12 = arith.constant 0 : index
    %26 = vector.load %arg2[%c1424, %c0_12] : memref<1808x384xbf16, #tpu.memory_space<vmem>>, vector<128x128xbf16>
    %27 = arith.truncf %25 : vector<8x128xf32> to vector<8x128xbf16>
    %cst_13 = arith.constant dense<0.000000e+00> : vector<8x128xf32>
    %28 = tpu.matmul %27, %26, %cst_13 {dimension_numbers = #tpu.dot_dimension_numbers<[1], [0], [0], [1], [0, 0, 1, 1], [], []>} : vector<8x128xbf16>, vector<128x128xbf16>, vector<8x128xf32> -> vector<8x128xf32>
    %29 = vector.extract_strided_slice %1 {offsets = [3, 0], sizes = [1, 128], strides = [1, 1]} : vector<8x384xf32> to vector<1x128xf32>
    %30 = vector.broadcast %29 : vector<1x128xf32> to vector<8x128xf32>
    %31 = arith.addf %28, %30 : vector<8x128xf32>
    %cst_14 = arith.constant 0.000000e+00 : f32
    %32 = vector.broadcast %cst_14 : f32 to vector<8x128xf32>
    %33 = arith.maximumf %31, %32 : vector<8x128xf32>
    %c1552 = arith.constant 1552 : index
    %c0_15 = arith.constant 0 : index
    %34 = vector.load %arg2[%c1552, %c0_15] : memref<1808x384xbf16, #tpu.memory_space<vmem>>, vector<128x128xbf16>
    %35 = arith.truncf %33 : vector<8x128xf32> to vector<8x128xbf16>
    %cst_16 = arith.constant dense<0.000000e+00> : vector<8x128xf32>
    %36 = tpu.matmul %35, %34, %cst_16 {dimension_numbers = #tpu.dot_dimension_numbers<[1], [0], [0], [1], [0, 0, 1, 1], [], []>} : vector<8x128xbf16>, vector<128x128xbf16>, vector<8x128xf32> -> vector<8x128xf32>
    %37 = vector.extract_strided_slice %1 {offsets = [4, 0], sizes = [1, 128], strides = [1, 1]} : vector<8x384xf32> to vector<1x128xf32>
    %38 = vector.broadcast %37 : vector<1x128xf32> to vector<8x128xf32>
    %39 = arith.addf %36, %38 : vector<8x128xf32>
    %cst_17 = arith.constant 0.000000e+00 : f32
    %40 = vector.broadcast %cst_17 : f32 to vector<8x128xf32>
    %41 = arith.maximumf %39, %40 : vector<8x128xf32>
    %c1680 = arith.constant 1680 : index
    %c0_18 = arith.constant 0 : index
    %42 = vector.load %arg2[%c1680, %c0_18] : memref<1808x384xbf16, #tpu.memory_space<vmem>>, vector<128x128xbf16>
    %43 = arith.truncf %41 : vector<8x128xf32> to vector<8x128xbf16>
    %cst_19 = arith.constant dense<0.000000e+00> : vector<8x128xf32>
    %44 = tpu.matmul %43, %42, %cst_19 {dimension_numbers = #tpu.dot_dimension_numbers<[1], [0], [0], [1], [0, 0, 1, 1], [], []>} : vector<8x128xbf16>, vector<128x128xbf16>, vector<8x128xf32> -> vector<8x128xf32>
    %45 = vector.extract_strided_slice %1 {offsets = [5, 0], sizes = [1, 128], strides = [1, 1]} : vector<8x384xf32> to vector<1x128xf32>
    %46 = vector.broadcast %45 : vector<1x128xf32> to vector<8x128xf32>
    %47 = arith.addf %44, %46 : vector<8x128xf32>
    %c0_20 = arith.constant 0 : index
    %c0_21 = arith.constant 0 : index
    %48 = vector.load %arg4[%c0_20, %c0_21] : memref<8x128xf32, #tpu.memory_space<vmem>>, vector<8x128xf32>
    tpu.vector_store %arg4[%c0_20, %c0_21], %47 {strides = array<i32>} : memref<8x128xf32, #tpu.memory_space<vmem>>, vector<8x128xf32>,
    return
  }
  func.func @transform_0(%arg0: i32) -> (i32, i32) {
    %c0_i32 = arith.constant 0 : i32
    %c0_i32_0 = arith.constant 0 : i32
    return %arg0, %c0_i32 : i32, i32
  }
  func.func @transform_1(%arg0: i32) -> (i32, i32) {
    %c0_i32 = arith.constant 0 : i32
    %c0_i32_0 = arith.constant 0 : i32
    %c0_i32_1 = arith.constant 0 : i32
    return %c0_i32, %c0_i32_0 : i32, i32
  }
  func.func @transform_2(%arg0: i32) -> (i32, i32) {
    %c0_i32 = arith.constant 0 : i32
    %c0_i32_0 = arith.constant 0 : i32
    %c0_i32_1 = arith.constant 0 : i32
    return %c0_i32, %c0_i32_0 : i32, i32
  }
  func.func @transform_3(%arg0: i32) -> (i32, i32) {
    %c0_i32 = arith.constant 0 : i32
    %c0_i32_0 = arith.constant 0 : i32
    return %arg0, %c0_i32 : i32, i32
  }
}

</mosaic_0001>

<bundles_post_ra>
// kernel: tpu_custom_call.1
= control target key start
LH: loop header
LB: loop body
LE: loop exit
PB: predicated region body
PF: predicated region fallthrough
CT: control target
= control target key end

     0   :  { %8 = vsyncpa [#allocation3], 0  ;;  %s3294_s0 = inlined_call_operand.hbm [shape: f32[8,784], index: 0, kind: input, shape index: {}]   ;;  %s3295_s1 = inlined_call_operand.hbm [shape: bf16[1808,384], index: 1, kind: input, shape index: {}]   ;;  %s3296_s2 = inlined_call_operand.hbm [shape: f32[8,384], index: 2, kind: input, shape index: {}]   ;;  %s3297_s3 = inlined_call_operand.hbm [shape: f32[8,128], index: 3, kind: output, shape index: {}]  }
   0x1   :  { %9 = vsyncpa [#allocation6], 0 }
   0x2   :  { %10 = vsyncpa [#allocation4], 0  ;;  %s3148_s12 = smov [#allocation5]   ;;  %s3054_s16 = scalar_lea.hbm %s3295_s1, 43392 }
   0x3   :  { %s26_s13 = sshll.u32 %s3148_s12, 4  ;;  %p3055_p0 = scmp.ne.s32.totalorder %s3295_s1, %s3054_s16  ;;  %s27_s13 = int_to_ptr.vmem [resolvable:$true] %s26_s13 }
   0x4   :  { %p3058_p1 = scmp.lt.u32.totalorder %s3054_s16, %s3295_s1 }
   0x6   :  { %p3060_p2 = pnand %p3058_p1, %p3055_p0 }
   0x8   :  { %3063 = shalt.err (!%p3060_p2)
}
   0x9   :  { %s3064_s21 = scalar_lea.vmem %s27_s13, 43392  ;;  %p3069_p4 = scmp.lt.s32.totalorder %s27_s13, %s27_s13 }
   0xa   :  { %p3065_p3 = scmp.ne.s32.totalorder %s27_s13, %s3064_s21  ;;  %p3070_p5 = scmp.lt.s32.totalorder %s3064_s21, %s3064_s21 }
   0xc   :  { %p3071_p6 = por %p3070_p5, %p3069_p4 }
   0xe   :  { %p3072_p7 = pnand %p3071_p6, %p3065_p3 }
  0x10   :  { %3075 = shalt.err (!%p3072_p7)
}
  0x11   :  { %s3149_s22 = smov 192   ;;  %s3150_s23 = smov 12  }
  0x12   :  { %32 = dma.hbm_to_vmem [thread:$0]  %s3295_s1, 43392, %s27_s13, [#allocation6], %s3149_s22, %s3149_s22, %s3150_s23  }
  0x13   :  { %s3151_s26 = smov [#allocation2]   ;;  %s3152_s28 = smov [#allocation7]  }
  0x14   :  { %s17_s27 = sshll.u32 %s3151_s26, 4  ;;  %s39_s29 = sshll.u32 %s3152_s28, 4  ;;  %s18_s27 = int_to_ptr.vmem [resolvable:$true] %s17_s27  ;;  %s40_s29 = int_to_ptr.vmem [resolvable:$true] %s39_s29 }
  0x15   :  { %s3076_s5 = scalar_lea.hbm %s3294_s0, 896 }
  0x16   :  { %p3077_p8 = scmp.ne.s32.totalorder %s3294_s0, %s3076_s5  ;;  %p3080_p9 = scmp.lt.u32.totalorder %s3076_s5, %s3294_s0 }
  0x18   :  { %p3082_p10 = pnand %p3080_p9, %p3077_p8 }
  0x1a   :  { %3085 = shalt.err (!%p3082_p10)
}
  0x1b   :  { %s3086_s1 = scalar_lea.vmem %s18_s27, 896  ;;  %p3091_p12 = scmp.lt.s32.totalorder %s18_s27, %s18_s27 }
  0x1c   :  { %p3087_p11 = scmp.ne.s32.totalorder %s18_s27, %s3086_s1  ;;  %p3092_p13 = scmp.lt.s32.totalorder %s3086_s1, %s3086_s1 }
  0x1e   :  { %p3093_p0 = por %p3092_p13, %p3091_p12 }
  0x20   :  { %p3094_p1 = pnand %p3093_p0, %p3087_p11 }
  0x22   :  { %3097 = shalt.err (!%p3094_p1)
}
  0x23   :  { %20 = dma.hbm_to_vmem [thread:$0]  %s3294_s0, 896, %s18_s27, [#allocation3]  }
  0x24   :  { %s3098_s14 = scalar_lea.hbm %s3296_s2, 384 }
  0x25   :  { %p3099_p2 = scmp.ne.s32.totalorder %s3296_s2, %s3098_s14  ;;  %p3102_p3 = scmp.lt.u32.totalorder %s3098_s14, %s3296_s2 }
  0x27   :  { %p3104_p4 = pnand %p3102_p3, %p3099_p2 }
  0x29   :  { %3107 = shalt.err (!%p3104_p4)
}
  0x2a   :  { %s3108_s19 = scalar_lea.vmem %s40_s29, 384  ;;  %p3113_p6 = scmp.lt.s32.totalorder %s40_s29, %s40_s29 }
  0x2b   :  { %p3109_p5 = scmp.ne.s32.totalorder %s40_s29, %s3108_s19  ;;  %p3114_p7 = scmp.lt.s32.totalorder %s3108_s19, %s3108_s19 }
  0x2d   :  { %p3115_p8 = por %p3114_p7, %p3113_p6 }
  0x2f   :  { %p3116_p9 = pnand %p3115_p8, %p3109_p5 }
  0x31   :  { %3119 = shalt.err (!%p3116_p9)
}
  0x32   :  { %42 = dma.hbm_to_vmem [thread:$0]  %s3296_s2, 384, %s40_s29, [#allocation6]  }
  0x33   :  { %3142 = dma.done.wait [#allocation3], 896  }
  0x34   :  { %3143 = vsyncadd [#allocation3], 4294966400 }
  0x35   :  { %3144 = dma.done.wait [#allocation6], 43776  }
  0x36   :  { %3145 = vsyncadd [#allocation6], 4294923520  ;;  %v2746_v0 = vld [vmem:[#allocation5 + $0x4] ss:$12 sps:$4 sm:$0xff]   ;;  %v2748_v1 = vld [vmem:[#allocation5] ss:$12 sps:$4 sm:$0xff]  }
  0x37   :  { %1066 = vmatprep.subr.bf16.mxu0 %v2746_v0  ;;  %v2749_v2 = vld [vmem:[#allocation5 + $0x1c] ss:$12 sps:$4 sm:$0xff]   ;;  %v2751_v3 = vld [vmem:[#allocation5 + $0x18] ss:$12 sps:$4 sm:$0xff]   ;;  %v2752_v4 = vld [vmem:[#allocation5 + $0x34] ss:$12 sps:$4 sm:$0xff]  }
  0x38   :  { %1067 = vmatpush1.bf16.msra.mxu0 %v2748_v1  ;;  %v2754_v5 = vld [vmem:[#allocation5 + $0x30] ss:$12 sps:$4 sm:$0xff]   ;;  %v2755_v6 = vld [vmem:[#allocation5 + $0x4c] ss:$12 sps:$4 sm:$0xff]   ;;  %v2757_v7 = vld [vmem:[#allocation5 + $0x48] ss:$12 sps:$4 sm:$0xff]  }
  0x39   :  { %1068 = vmatprep.subr.bf16.mxu0 %v2749_v2  ;;  %v2758_v8 = vld [vmem:[#allocation5 + $0x64] ss:$12 sps:$4 sm:$0xff]   ;;  %v2760_v9 = vld [vmem:[#allocation5 + $0x60] ss:$12 sps:$4 sm:$0xff]   ;;  %v2761_v10 = vld [vmem:[#allocation5 + $0x7c] ss:$12 sps:$4 sm:$0xff]  }
  0x3a   :  { %v2763_v11 = vld [vmem:[#allocation5 + $0x78] ss:$12 sps:$4 sm:$0xff]   ;;  %v2764_v12 = vld [vmem:[#allocation5 + $0x94] ss:$12 sps:$4 sm:$0xff]   ;;  %v2766_v15 = vld [vmem:[#allocation5 + $0x90] ss:$12 sps:$4 sm:$0xff]  }
  0x3b   :  { %v54_v13 = vld [vmem:[#allocation2 + $0x8] sm:$0xff]  ;;  %v2767_v16 = vld [vmem:[#allocation5 + $0xac] ss:$12 sps:$4 sm:$0xff]   ;;  %v2773_v24 = vld [vmem:[#allocation5 + $0xdc] ss:$12 sps:$4 sm:$0xff]   ;;  %vm3154_vm0 = vmmov 0  }
  0x3c   :  { %1069 = vmatpush1.bf16.msra.mxu0 %v2751_v3  ;;  %v260_v14 = vpack.c.bf16 %v54_v13, %v54_v13  ;;  %v2800_v17 = vld [vmem:[#allocation5 + $0xc8] ss:$12 sps:$4 sm:$0xff]   ;;  %v2770_v20 = vld [vmem:[#allocation5 + $0xc4] ss:$12 sps:$4 sm:$0xff]   ;;  %v2805_v21 = vld [vmem:[#allocation5 + $0xe0] ss:$12 sps:$4 sm:$0xff]  }
  0x3d   :  { %1070 = vmatprep.subr.bf16.mxu0 %v2752_v4  ;;  %v2801_v18 = vld [vmem:[#allocation5 + $0x8] ss:$12 sps:$4 sm:$0xff]   ;;  %2534 = vmatprep.subr.bf16.mxu1 %v2800_v17  ;;  %v2806_v22 = vld [vmem:[#allocation5 + $0x20] ss:$12 sps:$4 sm:$0xff]   ;;  %v2810_v25 = vld [vmem:[#allocation5 + $0xf8] ss:$12 sps:$4 sm:$0xff]  }
  0x3e   :  { %1098 = vmatprep.mubr.bf16.mxu0 %v260_v14  ;;  %1262 = vmatprep.mubr.bf16.mxu1 %v260_v14  ;;  %v2769_v19 = vld [vmem:[#allocation5 + $0xa8] ss:$12 sps:$4 sm:$0xff]   ;;  %v2772_v23 = vld [vmem:[#allocation5 + $0xc0] ss:$12 sps:$4 sm:$0xff]   ;;  %v2811_v26 = vld [vmem:[#allocation5 + $0x38] ss:$12 sps:$4 sm:$0xff]  }
  0x3f   :  { %2535 = vmatpush3.bf16.msra.mxu1 %v2801_v18  ;;  %v2775_v27 = vld [vmem:[#allocation5 + $0xd8] ss:$12 sps:$4 sm:$0xff]   ;;  %v2776_v28 = vld [vmem:[#allocation5 + $0xf4] ss:$12 sps:$4 sm:$0xff]   ;;  %v2815_v29 = vld [vmem:[#allocation5 + $0x110] ss:$12 sps:$4 sm:$0xff]  }
  0x40   :  { %1071 = vmatpush1.bf16.msra.mxu0 %v2754_v5  ;;  %2536 = vmatprep.subr.bf16.mxu1 %v2805_v21  ;;  %v2816_v30 = vld [vmem:[#allocation5 + $0x50] ss:$12 sps:$4 sm:$0xff]   ;;  %v2820_v32 = vld [vmem:[#allocation5 + $0x128] ss:$12 sps:$4 sm:$0xff]   ;;  %v2779_v33 = vld [vmem:[#allocation5 + $0x10c] ss:$12 sps:$4 sm:$0xff]  }
  0x41   :  { %1072 = vmatprep.subr.bf16.mxu0 %v2755_v6  ;;  %v2778_v31 = vld [vmem:[#allocation5 + $0xf0] ss:$12 sps:$4 sm:$0xff]   ;;  %v2821_v34 = vld [vmem:[#allocation5 + $0x68] ss:$12 sps:$4 sm:$0xff]   ;;  %v2825_v35 = vld [vmem:[#allocation5 + $0x140] ss:$12 sps:$4 sm:$0xff]  }
  0x42   :  { %v2781_v36 = vld [vmem:[#allocation5 + $0x108] ss:$12 sps:$4 sm:$0xff]   ;;  %v2782_v37 = vld [vmem:[#allocation5 + $0x124] ss:$12 sps:$4 sm:$0xff]   ;;  %v2826_v38 = vld [vmem:[#allocation5 + $0x80] ss:$12 sps:$4 sm:$0xff]  }
  0x43   :  { %2537 = vmatpush3.bf16.msra.mxu1 %v2806_v22  ;;  %v2830_v39 = vld [vmem:[#allocation5 + $0x158] ss:$12 sps:$4 sm:$0xff]   ;;  %v2784_v40 = vld [vmem:[#allocation5 + $0x120] ss:$12 sps:$4 sm:$0xff]   ;;  %v2785_v41 = vld [vmem:[#allocation5 + $0x13c] ss:$12 sps:$4 sm:$0xff]  }
  0x44   :  { %1073 = vmatpush1.bf16.msra.mxu0 %v2757_v7  ;;  %2538 = vmatprep.subr.bf16.mxu1 %v2810_v25  ;;  %v2831_v42 = vld [vmem:[#allocation5 + $0x98] ss:$12 sps:$4 sm:$0xff]   ;;  %v2835_v43 = vld [vmem:[#allocation5 + $0x170] ss:$12 sps:$4 sm:$0xff]   ;;  %v2788_v45 = vld [vmem:[#allocation5 + $0x154] ss:$12 sps:$4 sm:$0xff]  }
  0x45   :  { %1074 = vmatprep.subr.bf16.mxu0 %v2758_v8  ;;  %v2787_v44 = vld [vmem:[#allocation5 + $0x138] ss:$12 sps:$4 sm:$0xff]   ;;  %v2836_v46 = vld [vmem:[#allocation5 + $0xb0] ss:$12 sps:$4 sm:$0xff]   ;;  %v2840_v47 = vld [vmem:[#allocation5 + $0x248] ss:$12 sps:$4 sm:$0xff]  }
  0x46   :  { %v2790_v48 = vld [vmem:[#allocation5 + $0x150] ss:$12 sps:$4 sm:$0xff]   ;;  %v53_v49 = vld [vmem:[#allocation2] sm:$0xff]  ;;  %v2850_v57 = vld [vmem:[#allocation5 + $0x278] ss:$12 sps:$4 sm:$0xff]   ;;  %vm1062_vm1 = vcmask 130048  }
  0x47   :  { %2539 = vmatpush3.bf16.msra.mxu1 %v2811_v26  ;;  %v2791_v50 = vld [vmem:[#allocation5 + $0x16c] ss:$12 sps:$4 sm:$0xff]   ;;  %v2841_v51 = vld [vmem:[#allocation5 + $0x188] ss:$12 sps:$4 sm:$0xff]   ;;  %v259_v52 = vpack.c.bf16 %v53_v49, %v53_v49  ;;  %v2796_v55 = vld [vmem:[#allocation5 + $0x184] ss:$12 sps:$4 sm:$0xff]  }
  0x48   :  { %1075 = vmatpush1.bf16.msra.mxu0 %v2760_v9  ;;  %2540 = vmatprep.subr.bf16.mxu1 %v2815_v29  ;;  %v2845_v53 = vld [vmem:[#allocation5 + $0x260] ss:$12 sps:$4 sm:$0xff]   ;;  %v2793_v54 = vld [vmem:[#allocation5 + $0x168] ss:$12 sps:$4 sm:$0xff]   ;;  %v2851_v60 = vld [vmem:[#allocation5 + $0x1b8] ss:$12 sps:$4 sm:$0xff]  }
  0x49   :  { %1076 = vmatprep.subr.bf16.mxu0 %v2761_v10  ;;  %v2846_v56 = vld [vmem:[#allocation5 + $0x1a0] ss:$12 sps:$4 sm:$0xff]   ;;  %v2799_v59 = vld [vmem:[#allocation5 + $0x19c] ss:$12 sps:$4 sm:$0xff]   ;;  %v2797_v62 = vld [vmem:[#allocation5 + $0x198] ss:$12 sps:$4 sm:$0xff]  }
  0x4a   :  { %v2794_v58 = vld [vmem:[#allocation5 + $0x180] ss:$12 sps:$4 sm:$0xff]   ;;  %v2855_v61 = vld [vmem:[#allocation5 + $0x290] ss:$12 sps:$4 sm:$0xff]   ;;  %v2860_v1 = vld [vmem:[#allocation5 + $0x2a8] ss:$12 sps:$4 sm:$0xff]  }
  0x4b   :  { %2541 = vmatpush3.bf16.msra.mxu1 %v2816_v30  ;;  %v2804_v63 = vld [vmem:[#allocation5 + $0x1b4] ss:$12 sps:$4 sm:$0xff]   ;;  %v2856_v0 = vld [vmem:[#allocation5 + $0x1d0] ss:$12 sps:$4 sm:$0xff]   ;;  %v2809_v3 = vld [vmem:[#allocation5 + $0x1cc] ss:$12 sps:$4 sm:$0xff]  }
  0x4c   :  { %1077 = vmatpush1.bf16.msra.mxu0 %v2763_v11  ;;  %2542 = vmatprep.subr.bf16.mxu1 %v2820_v32  ;;  %v2802_v2 = vld [vmem:[#allocation5 + $0x1b0] ss:$12 sps:$4 sm:$0xff]   ;;  %v2861_v4 = vld [vmem:[#allocation5 + $0x1e8] ss:$12 sps:$4 sm:$0xff]   ;;  %v2865_v5 = vld [vmem:[#allocation5 + $0x2c0] ss:$12 sps:$4 sm:$0xff]  }
  0x4d   :  { %1078 = vmatprep.subr.bf16.mxu0 %v2764_v12  ;;  %v56_v6 = vld [vmem:[#allocation2 + $0x18] sm:$0xff]  ;;  %v2807_v7 = vld [vmem:[#allocation5 + $0x1c8] ss:$12 sps:$4 sm:$0xff]   ;;  %v2876_v18 = vld [vmem:[#allocation5 + $0x230] ss:$12 sps:$4 sm:$0xff]   ;;  %s3156_s2 = smov [#allocation8]  }
  0x4e   :  { %v262_v8 = vpack.c.bf16 %v56_v6, %v56_v6  ;;  %v2814_v9 = vld [vmem:[#allocation5 + $0x1e4] ss:$12 sps:$4 sm:$0xff]   ;;  %v2866_v10 = vld [vmem:[#allocation5 + $0x200] ss:$12 sps:$4 sm:$0xff]   ;;  %v2819_v13 = vld [vmem:[#allocation5 + $0x1fc] ss:$12 sps:$4 sm:$0xff]  }
  0x4f   :  { %2543 = vmatpush3.bf16.msra.mxu1 %v2821_v34  ;;  %v2870_v11 = vld [vmem:[#allocation5 + $0x2d8] ss:$12 sps:$4 sm:$0xff]   ;;  %v2812_v12 = vld [vmem:[#allocation5 + $0x1e0] ss:$12 sps:$4 sm:$0xff]   ;;  %v2822_v21 = vld [vmem:[#allocation5 + $0x210] ss:$12 sps:$4 sm:$0xff]  }
  0x50   :  { %1079 = vmatpush1.bf16.msra.mxu0 %v2766_v15  ;;  %2544 = vmatprep.subr.bf16.mxu1 %v2825_v35  ;;  %v2871_v14 = vld [vmem:[#allocation5 + $0x218] ss:$12 sps:$4 sm:$0xff]   ;;  %v2875_v15 = vld [vmem:[#allocation5 + $0x2f0] ss:$12 sps:$4 sm:$0xff]   ;;  %v2824_v17 = vld [vmem:[#allocation5 + $0x214] ss:$12 sps:$4 sm:$0xff]  }
  0x51   :  { %1080 = vmatprep.subr.bf16.mxu0 %v2767_v16  ;;  %v2817_v16 = vld [vmem:[#allocation5 + $0x1f8] ss:$12 sps:$4 sm:$0xff]   ;;  %v2885_v25 = vld [vmem:[#allocation5 + $0x3e0] ss:$12 sps:$4 sm:$0xff]   ;;  %v2827_v26 = vld [vmem:[#allocation5 + $0x228] ss:$12 sps:$4 sm:$0xff]  }
  0x52   :  { %v2829_v22 = vld [vmem:[#allocation5 + $0x22c] ss:$12 sps:$4 sm:$0xff]   ;;  %v2844_v35 = vld [vmem:[#allocation5 + $0x274] ss:$12 sps:$4 sm:$0xff]   ;;  %v2859_v49 = vld [vmem:[#allocation5 + $0x2bc] ss:$12 sps:$4 sm:$0xff]  }
  0x53   :  { %2545 = vmatpush3.bf16.msra.mxu1 %v2826_v38  ;;  %v2890_v29 = vld [vmem:[#allocation5 + $0x3f8] ss:$12 sps:$4 sm:$0xff]   ;;  %v2832_v30 = vld [vmem:[#allocation5 + $0x240] ss:$12 sps:$4 sm:$0xff]   ;;  %v2842_v38 = vld [vmem:[#allocation5 + $0x270] ss:$12 sps:$4 sm:$0xff]  }
  0x54   :  { %1081 = vmatpush1.bf16.msra.mxu0 %v2769_v19  ;;  %2546 = vmatprep.subr.bf16.mxu1 %v2830_v39  ;;  %v2880_v19 = vld [vmem:[#allocation5 + $0x3c8] ss:$12 sps:$4 sm:$0xff]   ;;  %v2891_v32 = vld [vmem:[#allocation5 + $0x338] ss:$12 sps:$4 sm:$0xff]   ;;  %s2287_s21 = sshll.u32 %s3156_s2, 4  ;;  %s2288_s21 = int_to_ptr.vmem [resolvable:$true] %s2287_s21 }
  0x55   :  { %1082 = vmatprep.subr.bf16.mxu0 %v2770_v20  ;;  %v55_v20 = vld [vmem:[#allocation2 + $0x10] sm:$0xff]  ;;  %s3120_s22 = scalar_lea.vmem %s2288_s21, 128  ;;  %p3125_p11 = scmp.lt.s32.totalorder %s2288_s21, %s2288_s21 }
  0x56   :  { %v2837_v34 = vld [vmem:[#allocation5 + $0x258] ss:$12 sps:$4 sm:$0xff]   ;;  %p3121_p10 = scmp.ne.s32.totalorder %s2288_s21, %s3120_s22  ;;  %p3126_p12 = scmp.lt.s32.totalorder %s3120_s22, %s3120_s22 }
  0x57   :  { %2547 = vmatpush3.bf16.msra.mxu1 %v2831_v42  ;;  %v2849_v39 = vld [vmem:[#allocation5 + $0x28c] ss:$12 sps:$4 sm:$0xff]   ;;  %v58_v42 = vld [vmem:[#allocation2 + $0x28] sm:$0xff] }
  0x58   :  { %1083 = vmatpush1.bf16.msra.mxu0 %v2772_v23  ;;  %2548 = vmatprep.subr.bf16.mxu1 %v2835_v43  ;;  %v2881_v23 = vld [vmem:[#allocation5 + $0x308] ss:$12 sps:$4 sm:$0xff]   ;;  %v2877_v6 = vld [vmem:[#allocation5 + $0x318] ss:$12 sps:$4 sm:$0xff]   ;;  %p3127_p13 = por %p3126_p12, %p3125_p11 }
  0x59   :  { %1084 = vmatprep.subr.bf16.mxu0 %v2773_v24  ;;  %v3213_v24 = vpack.c.bf16 %v55_v20, %v55_v20  ;;  %v2847_v43 = vld [vmem:[#allocation5 + $0x288] ss:$12 sps:$4 sm:$0xff]  }
  0x5a   :  { %v2904_v20 = vld [vmem:[#allocation5 + $0x394] ss:$12 sps:$4 sm:$0xff]   ;;  %p3128_p0 = pnand %p3127_p13, %p3121_p10 }
  0x5b   :  { %2549 = vmatpush3.bf16.msra.mxu1 %v2836_v46  ;;  %v2906_v46 = vld [vmem:[#allocation5 + $0x380] ss:$12 sps:$4 sm:$0xff]  }
  0x5c   :  { %1085 = vmatpush1.bf16.msra.mxu0 %v2775_v27  ;;  %2556 = vmatprep.subr.bf16.mxu1 %v2840_v47  ;;  %v2834_v27 = vld [vmem:[#allocation5 + $0x244] ss:$12 sps:$4 sm:$0xff]  }
  0x5d   :  { %1086 = vmatprep.subr.bf16.mxu0 %v2776_v28  ;;  %v2886_v28 = vld [vmem:[#allocation5 + $0x320] ss:$12 sps:$4 sm:$0xff]   ;;  %v2910_v47 = vld [vmem:[#allocation5 + $0x458] ss:$12 sps:$4 sm:$0xff]  }
  0x5e   :  { %1263 = vmatmul.mubr.bf16.vlgmr.msra.gmra.mrb[0].mxu1 %v259_v52 }
  0x5f   :  { %2557 = vmatpush3.bf16.msra.mxu1 %v2841_v51  ;;  %1302 = vmatprep.mubr.bf16.mxu1 %v262_v8  ;;  %v2915_v51 = vld [vmem:[#allocation5 + $0x470] ss:$12 sps:$4 sm:$0xff]  }
  0x60   :  { %1087 = vmatpush1.bf16.msra.mxu0 %v2778_v31  ;;  %2558 = vmatprep.subr.bf16.mxu1 %v2845_v53  ;;  %v2839_v31 = vld [vmem:[#allocation5 + $0x25c] ss:$12 sps:$4 sm:$0xff]   ;;  %v2864_v53 = vld [vmem:[#allocation5 + $0x2d4] ss:$12 sps:$4 sm:$0xff]  }
  0x61   :  { %1088 = vmatprep.subr.bf16.mxu0 %v2779_v33  ;;  %v2895_v33 = vld [vmem:[#allocation5 + $0x410] ss:$12 sps:$4 sm:$0xff]  }
  0x63   :  { %2559 = vmatpush3.bf16.msra.mxu1 %v2846_v56  ;;  %v2862_v56 = vld [vmem:[#allocation5 + $0x2d0] ss:$12 sps:$4 sm:$0xff]  }
  0x64   :  { %1089 = vmatpush1.bf16.msra.mxu0 %v2781_v36  ;;  %2560 = vmatprep.subr.bf16.mxu1 %v2850_v57  ;;  %v2896_v36 = vld [vmem:[#allocation5 + $0x350] ss:$12 sps:$4 sm:$0xff]  }
  0x65   :  { %1090 = vmatprep.subr.bf16.mxu0 %v2782_v37  ;;  %v2900_v37 = vld [vmem:[#allocation5 + $0x428] ss:$12 sps:$4 sm:$0xff]  }
  0x67   :  { %2561 = vmatpush3.bf16.msra.mxu1 %v2851_v60  ;;  %v2867_v60 = vld [vmem:[#allocation5 + $0x2e8] ss:$12 sps:$4 sm:$0xff]  }
  0x68   :  { %1091 = vmatpush1.bf16.msra.mxu0 %v2784_v40  ;;  %2562 = vmatprep.subr.bf16.mxu1 %v2855_v61  ;;  %v2901_v40 = vld [vmem:[#allocation5 + $0x368] ss:$12 sps:$4 sm:$0xff]   ;;  %v3153_v61 = vmov 0.0  }
  0x69   :  { %1092 = vmatprep.subr.bf16.mxu0 %v2785_v41  ;;  %v2905_v41 = vld [vmem:[#allocation5 + $0x440] ss:$12 sps:$4 sm:$0xff]  }
  0x6b   :  { %2563 = vmatpush3.bf16.msra.mxu1 %v2856_v0  ;;  %v59_v0 = vld [vmem:[#allocation2 + $0x30] sm:$0xff] }
  0x6c   :  { %1093 = vmatpush1.bf16.msra.mxu0 %v2787_v44  ;;  %2564 = vmatprep.subr.bf16.mxu1 %v2860_v1  ;;  %v264_v44 = vpack.c.bf16 %v58_v42, %v58_v42  ;;  %v2872_v1 = vld [vmem:[#allocation5 + $0x300] ss:$12 sps:$4 sm:$0xff]  }
  0x6d   :  { %1094 = vmatprep.subr.bf16.mxu0 %v2788_v45  ;;  %v2854_v45 = vld [vmem:[#allocation5 + $0x2a4] ss:$12 sps:$4 sm:$0xff]   ;;  %v2938_v42 = vld [vmem:[#allocation5 + $0x46c] ss:$12 sps:$4 sm:$0xff]  }
  0x6f   :  { %2565 = vmatpush3.bf16.msra.mxu1 %v2861_v4  ;;  %v2942_v4 = vld [vmem:[#allocation5 + $0x498] ss:$12 sps:$4 sm:$0xff]  }
  0x70   :  { %1095 = vmatpush1.bf16.msra.mxu0 %v2790_v48  ;;  %2566 = vmatprep.subr.bf16.mxu1 %v2865_v5  ;;  %v2852_v48 = vld [vmem:[#allocation5 + $0x2a0] ss:$12 sps:$4 sm:$0xff]  }
  0x71   :  { %1096 = vmatprep.subr.bf16.mxu0 %v2791_v50  ;;  %v2911_v50 = vld [vmem:[#allocation5 + $0x398] ss:$12 sps:$4 sm:$0xff]   ;;  %v2947_v5 = vld [vmem:[#allocation5 + $0x4b4] ss:$12 sps:$4 sm:$0xff]  }
  0x73   :  { %2567 = vmatpush3.bf16.msra.mxu1 %v2866_v10  ;;  %v2882_v10 = vld [vmem:[#allocation5 + $0x330] ss:$12 sps:$4 sm:$0xff]  }
  0x74   :  { %1097 = vmatpush1.bf16.msra.mxu0 %v2793_v54  ;;  %2568 = vmatprep.subr.bf16.mxu1 %v2870_v11  ;;  %v2916_v54 = vld [vmem:[#allocation5 + $0x3b0] ss:$12 sps:$4 sm:$0xff]   ;;  %v2889_v11 = vld [vmem:[#allocation5 + $0x34c] ss:$12 sps:$4 sm:$0xff]  }
  0x75   :  { %1107 = vmatprep.subr.bf16.mxu0 %v2796_v55  ;;  %v57_v55 = vld [vmem:[#allocation2 + $0x20] sm:$0xff] }
  0x76   :  { %v3216_v57 = vpack.c.bf16 %v57_v55, %v57_v55  ;;  %v2974_v55 = vld [vmem:[#allocation5 + $0x58c] ss:$12 sps:$4 sm:$0xff]  }
  0x77   :  { %1099 = vmatmul.mubr.bf16.vlgmr.msra.gmra.mrb[0].mxu0 %v259_v52  ;;  %2569 = vmatpush3.bf16.msra.mxu1 %v2871_v14  ;;  %v2857_v52 = vld [vmem:[#allocation5 + $0x2b8] ss:$12 sps:$4 sm:$0xff]   ;;  %v2887_v14 = vld [vmem:[#allocation5 + $0x348] ss:$12 sps:$4 sm:$0xff]  }
  0x78   :  { %1108 = vmatpush1.bf16.msra.mxu0 %v2794_v58  ;;  %1139 = vmatprep.mubr.bf16.mxu0 %v262_v8  ;;  %v2869_v58 = vld [vmem:[#allocation5 + $0x2ec] ss:$12 sps:$4 sm:$0xff]   ;;  %v2945_v8 = vld [vmem:[#allocation5 + $0x4b0] ss:$12 sps:$4 sm:$0xff]  }
  0x79   :  { %1109 = vmatprep.subr.bf16.mxu0 %v2799_v59  ;;  %2570 = vmatprep.subr.bf16.mxu1 %v2875_v15  ;;  %v2923_v59 = vld [vmem:[#allocation5 + $0x488] ss:$12 sps:$4 sm:$0xff]   ;;  %v2894_v15 = vld [vmem:[#allocation5 + $0x364] ss:$12 sps:$4 sm:$0xff]  }
  0x7b   :  { %2571 = vmatpush3.bf16.msra.mxu1 %v2876_v18  ;;  %v2899_v18 = vld [vmem:[#allocation5 + $0x37c] ss:$12 sps:$4 sm:$0xff]  }
  0x7c   :  { %1110 = vmatpush1.bf16.msra.mxu0 %v2797_v62  ;;  %2578 = vmatprep.subr.bf16.mxu1 %v2880_v19  ;;  %v2944_v62 = vld [vmem:[#allocation5 + $0x49c] ss:$12 sps:$4 sm:$0xff]   ;;  %v2897_v19 = vld [vmem:[#allocation5 + $0x378] ss:$12 sps:$4 sm:$0xff]  }
  0x7d   :  { %1111 = vmatprep.subr.bf16.mxu0 %v2804_v63  ;;  %v2874_v63 = vld [vmem:[#allocation5 + $0x304] ss:$12 sps:$4 sm:$0xff]  }
  0x7e   :  { %1303 = vmatmul.mubr.bf16.vlgmr.msra.gmra.mrb[4].mxu1 %v3213_v24 }
  0x7f   :  { %2579 = vmatpush3.bf16.msra.mxu1 %v2881_v23  ;;  %1342 = vmatprep.mubr.bf16.mxu1 %v264_v44  ;;  %v2902_v23 = vld [vmem:[#allocation5 + $0x390] ss:$12 sps:$4 sm:$0xff]  }
  0x80   :  { %1112 = vmatpush1.bf16.msra.mxu0 %v2802_v2  ;;  %2580 = vmatprep.subr.bf16.mxu1 %v2885_v25  ;;  %v2879_v2 = vld [vmem:[#allocation5 + $0x31c] ss:$12 sps:$4 sm:$0xff]  }
  0x81   :  { %1113 = vmatprep.subr.bf16.mxu0 %v2809_v3  ;;  %v3222_v3 = vpack.c.bf16 %v59_v0, %v59_v0  ;;  %v2907_v25 = vld [vmem:[#allocation5 + $0x3a8] ss:$12 sps:$4 sm:$0xff]  }
  0x83   :  { %2581 = vmatpush3.bf16.msra.mxu1 %v2886_v28  ;;  %v2919_v28 = vld [vmem:[#allocation5 + $0x3dc] ss:$12 sps:$4 sm:$0xff]  }
  0x84   :  { %1114 = vmatpush1.bf16.msra.mxu0 %v2807_v7  ;;  %2582 = vmatprep.subr.bf16.mxu1 %v2890_v29  ;;  %v2884_v7 = vld [vmem:[#allocation5 + $0x334] ss:$12 sps:$4 sm:$0xff]   ;;  %v2917_v29 = vld [vmem:[#allocation5 + $0x3d8] ss:$12 sps:$4 sm:$0xff]  }
  0x85   :  { %1115 = vmatprep.subr.bf16.mxu0 %v2814_v9  ;;  %v2950_v9 = vld [vmem:[#allocation5 + $0x4cc] ss:$12 sps:$4 sm:$0xff]  }
  0x87   :  { %2583 = vmatpush3.bf16.msra.mxu1 %v2891_v32  ;;  %v2926_v32 = vld [vmem:[#allocation5 + $0x40c] ss:$12 sps:$4 sm:$0xff]  }
  0x88   :  { %1116 = vmatpush1.bf16.msra.mxu0 %v2812_v12  ;;  %2584 = vmatprep.subr.bf16.mxu1 %v2895_v33  ;;  %v2948_v12 = vld [vmem:[#allocation5 + $0x4c8] ss:$12 sps:$4 sm:$0xff]  }
  0x89   :  { %1117 = vmatprep.subr.bf16.mxu0 %v2819_v13  ;;  %v2953_v13 = vld [vmem:[#allocation5 + $0x4e4] ss:$12 sps:$4 sm:$0xff]   ;;  %v2924_v33 = vld [vmem:[#allocation5 + $0x408] ss:$12 sps:$4 sm:$0xff]  }
  0x8b   :  { %2585 = vmatpush3.bf16.msra.mxu1 %v2896_v36  ;;  %v2932_v36 = vld [vmem:[#allocation5 + $0x43c] ss:$12 sps:$4 sm:$0xff]  }
  0x8c   :  { %1118 = vmatpush1.bf16.msra.mxu0 %v2817_v16  ;;  %2586 = vmatprep.subr.bf16.mxu1 %v2900_v37  ;;  %v2951_v16 = vld [vmem:[#allocation5 + $0x4e0] ss:$12 sps:$4 sm:$0xff]   ;;  %v2957_v37 = vld [vmem:[#allocation5 + $0x510] ss:$12 sps:$4 sm:$0xff]  }
  0x8d   :  { %1119 = vmatprep.subr.bf16.mxu0 %v2824_v17  ;;  %v2892_v17 = vld [vmem:[#allocation5 + $0x360] ss:$12 sps:$4 sm:$0xff]  }
  0x8f   :  { %2587 = vmatpush3.bf16.msra.mxu1 %v2901_v40  ;;  %v2935_v40 = vld [vmem:[#allocation5 + $0x454] ss:$12 sps:$4 sm:$0xff]  }
  0x90   :  { %1120 = vmatpush1.bf16.msra.mxu0 %v2822_v21  ;;  %2588 = vmatprep.subr.bf16.mxu1 %v2905_v41  ;;  %v2954_v21 = vld [vmem:[#allocation5 + $0x4f8] ss:$12 sps:$4 sm:$0xff]   ;;  %v2933_v41 = vld [vmem:[#allocation5 + $0x450] ss:$12 sps:$4 sm:$0xff]  }
  0x91   :  { %1121 = vmatprep.subr.bf16.mxu0 %v2829_v22  ;;  %v2956_v22 = vld [vmem:[#allocation5 + $0x4fc] ss:$12 sps:$4 sm:$0xff]  }
  0x93   :  { %2589 = vmatpush3.bf16.msra.mxu1 %v2906_v46  ;;  %v3155_v46 = vmov 0  }
  0x94   :  { %1122 = vmatpush1.bf16.msra.mxu0 %v2827_v26  ;;  %2590 = vmatprep.subr.bf16.mxu1 %v2910_v47  ;;  %v2914_v26 = vld [vmem:[#allocation5 + $0x3c4] ss:$12 sps:$4 sm:$0xff]   ;;  %v2960_v47 = vld [vmem:[#allocation5 + $0x528] ss:$12 sps:$4 sm:$0xff]  }
  0x95   :  { %1123 = vmatprep.subr.bf16.mxu0 %v2834_v27  ;;  %v2912_v27 = vld [vmem:[#allocation5 + $0x3c0] ss:$12 sps:$4 sm:$0xff]  }
  0x97   :  { %2591 = vmatpush3.bf16.msra.mxu1 %v2911_v50  ;;  %v2965_v50 = vld [vmem:[#allocation5 + $0x544] ss:$12 sps:$4 sm:$0xff]  }
  0x98   :  { %1124 = vmatpush1.bf16.msra.mxu0 %v2832_v30  ;;  %2592 = vmatprep.subr.bf16.mxu1 %v2915_v51  ;;  %v2922_v30 = vld [vmem:[#allocation5 + $0x3f4] ss:$12 sps:$4 sm:$0xff]   ;;  %v2968_v51 = vld [vmem:[#allocation5 + $0x55c] ss:$12 sps:$4 sm:$0xff]  }
  0x99   :  { %1125 = vmatprep.subr.bf16.mxu0 %v2839_v31  ;;  %v2920_v31 = vld [vmem:[#allocation5 + $0x3f0] ss:$12 sps:$4 sm:$0xff]  }
  0x9b   :  { %2593 = vmatpush3.bf16.msra.mxu1 %v2916_v54  ;;  %v2969_v54 = vld [vmem:[#allocation5 + $0x570] ss:$12 sps:$4 sm:$0xff]  }
  0x9c   :  { %1126 = vmatpush1.bf16.msra.mxu0 %v2837_v34  ;;  %2651 = vmatprep.subr.bf16.mxu1 %v3153_v61  ;;  %v2929_v34 = vld [vmem:[#allocation5 + $0x424] ss:$12 sps:$4 sm:$0xff]  }
  0x9d   :  { %1127 = vmatprep.subr.bf16.mxu0 %v2844_v35  ;;  %v2927_v35 = vld [vmem:[#allocation5 + $0x420] ss:$12 sps:$4 sm:$0xff]  }
  0x9e   :  { %1343 = vmatmul.mubr.bf16.vlgmr.msra.gmra.mrb[8].mxu1 %v3216_v57 }
  0x9f   :  { %2652 = vmatpush3.bf16.msra.mxu1 %v2923_v59  ;;  %2653 = vmatprep.mubr.msk.bf16.mxu1 %vm3154_vm0, %v3153_v61  ;;  %v2980_v59 = vld [vmem:[#allocation5 + $0x5bc] ss:$12 sps:$4 sm:$0xff]  }
  0xa0   :  { %1128 = vmatpush1.bf16.msra.mxu0 %v2842_v38  ;;  %1692 = vmatprep.subr.bf16.mxu1 %v2944_v62  ;;  %v2959_v38 = vld [vmem:[#allocation5 + $0x514] ss:$12 sps:$4 sm:$0xff]  }
  0xa1   :  { %1129 = vmatprep.subr.bf16.mxu0 %v2849_v39  ;;  %v2930_v39 = vld [vmem:[#allocation5 + $0x438] ss:$12 sps:$4 sm:$0xff]   ;;  %v2983_v62 = vld [vmem:[#allocation5 + $0x5d4] ss:$12 sps:$4 sm:$0xff]  }
  0xa4   :  { %1130 = vmatpush1.bf16.msra.mxu0 %v2847_v43  ;;  %v2936_v43 = vld [vmem:[#allocation5 + $0x468] ss:$12 sps:$4 sm:$0xff]  }
  0xa5   :  { %1131 = vmatprep.subr.bf16.mxu0 %v2854_v45  ;;  %v2939_v45 = vld [vmem:[#allocation5 + $0x480] ss:$12 sps:$4 sm:$0xff]  }
  0xa6   :  { %2654 = vmatmul.mubr.msk.bf16.vlgmr.msra.gmra.mrb[12].mxu1 %vm1062_vm1, %v3222_v3 }
  0xa7   :  { %1693 = vmatpush1.bf16.msra.mxu1 %v2942_v4 }
  0xa8   :  { %1132 = vmatpush1.bf16.msra.mxu0 %v2852_v48  ;;  %1694 = vmatprep.subr.bf16.mxu1 %v2947_v5  ;;  %v2962_v48 = vld [vmem:[#allocation5 + $0x52c] ss:$12 sps:$4 sm:$0xff]   ;;  %v266_v5 = vlaneseq }
  0xa9   :  { %1133 = vmatprep.subr.bf16.mxu0 %v2859_v49  ;;  %v2963_v49 = vld [vmem:[#allocation5 + $0x540] ss:$12 sps:$4 sm:$0xff]  }
  0xab   :  { %1695 = vmatpush1.bf16.msra.mxu1 %v2945_v8  ;;  %v3231_v8 = vshrl.u32 %v266_v5, 7  ;;  %v3002_v5 = vld [vmem:[#allocation5 + $0x678] ss:$12 sps:$4 sm:$0xff]  }
  0xac   :  { %1134 = vmatpush1.bf16.msra.mxu0 %v2857_v52  ;;  %1696 = vmatprep.subr.bf16.mxu1 %v2950_v9  ;;  %v2966_v52 = vld [vmem:[#allocation5 + $0x558] ss:$12 sps:$4 sm:$0xff]  }
  0xad   :  { %1135 = vmatprep.subr.bf16.mxu0 %v2864_v53  ;;  %v2971_v53 = vld [vmem:[#allocation5 + $0x574] ss:$12 sps:$4 sm:$0xff]   ;;  %v2989_v9 = vld [vmem:[#allocation5 + $0x604] ss:$12 sps:$4 sm:$0xff]  }
  0xaf   :  { %1697 = vmatpush1.bf16.msra.mxu1 %v2948_v12  ;;  %v62_v12 = vld [vmem:[#allocation7 + $0x10] sm:$0xff] }
  0xb0   :  { %1136 = vmatpush1.bf16.msra.mxu0 %v2862_v56  ;;  %1698 = vmatprep.subr.bf16.mxu1 %v2953_v13  ;;  %v2972_v56 = vld [vmem:[#allocation5 + $0x588] ss:$12 sps:$4 sm:$0xff]  }
  0xb1   :  { %1137 = vmatprep.subr.bf16.mxu0 %v2869_v58  ;;  %v2975_v58 = vld [vmem:[#allocation5 + $0x5a0] ss:$12 sps:$4 sm:$0xff]   ;;  %v2992_v13 = vld [vmem:[#allocation5 + $0x61c] ss:$12 sps:$4 sm:$0xff]  }
  0xb3   :  { %1699 = vmatpush1.bf16.msra.mxu1 %v2951_v16 }
  0xb4   :  { %1138 = vmatpush1.bf16.msra.mxu0 %v2867_v60  ;;  %1700 = vmatprep.subr.bf16.mxu1 %v2956_v22  ;;  %v2978_v60 = vld [vmem:[#allocation5 + $0x5b8] ss:$12 sps:$4 sm:$0xff]  }
  0xb5   :  { %1148 = vmatprep.subr.bf16.mxu0 %v2874_v63  ;;  %v2981_v63 = vld [vmem:[#allocation5 + $0x5d0] ss:$12 sps:$4 sm:$0xff]   ;;  %v3014_v22 = vld [vmem:[#allocation5 + $0x798] ss:$12 sps:$4 sm:$0xff]  }
  0xb7   :  { %1140 = vmatmul.mubr.bf16.vlgmr.msra.gmra.mrb[0].mxu0 %v3213_v24  ;;  %1701 = vmatpush1.bf16.msra.mxu1 %v2954_v21  ;;  %v2909_v24 = vld [vmem:[#allocation5 + $0x3ac] ss:$12 sps:$4 sm:$0xff]  }
  0xb8   :  { %1149 = vmatpush1.bf16.msra.mxu0 %v2872_v1  ;;  %1180 = vmatprep.mubr.bf16.mxu0 %v264_v44  ;;  %v2941_v44 = vld [vmem:[#allocation5 + $0x484] ss:$12 sps:$4 sm:$0xff]  }
  0xb9   :  { %1150 = vmatprep.subr.bf16.mxu0 %v2879_v2  ;;  %1702 = vmatprep.subr.bf16.mxu1 %v2959_v38 }
  0xbb   :  { %1703 = vmatpush1.bf16.msra.mxu1 %v2957_v37  ;;  %v3022_v37 = vld [vmem:[#allocation5 + $0x7f8] ss:$12 sps:$4 sm:$0xff]  }
  0xbc   :  { %1151 = vmatpush1.bf16.msra.mxu0 %v2877_v6  ;;  %1704 = vmatprep.subr.bf16.mxu1 %v2962_v48  ;;  %v2986_v6 = vld [vmem:[#allocation5 + $0x5ec] ss:$12 sps:$4 sm:$0xff]  }
  0xbd   :  { %1152 = vmatprep.subr.bf16.mxu0 %v2884_v7  ;;  %v2984_v7 = vld [vmem:[#allocation5 + $0x5e8] ss:$12 sps:$4 sm:$0xff]  }
  0xbf   :  { %1705 = vmatpush1.bf16.msra.mxu1 %v2960_v47  ;;  %v3236_v47 = vld [vmem:[#allocation7 + $0x8] sm:$0xff] }
  0xc0   :  { %1153 = vmatpush1.bf16.msra.mxu0 %v2882_v10  ;;  %1706 = vmatprep.subr.bf16.mxu1 %v2965_v50  ;;  %v2987_v10 = vld [vmem:[#allocation5 + $0x600] ss:$12 sps:$4 sm:$0xff]  }
  0xc1   :  { %1154 = vmatprep.subr.bf16.mxu0 %v2889_v11  ;;  %v268_v11 = vsub.s32 0, %v3231_v8 }
  0xc3   :  { %1707 = vmatpush1.bf16.msra.mxu1 %v2963_v49  ;;  %v273_v49 = vrot.slane %v3236_v47, %v268_v11 }
  0xc4   :  { %1155 = vmatpush1.bf16.msra.mxu0 %v2887_v14  ;;  %1708 = vmatprep.subr.bf16.mxu1 %v2968_v51  ;;  %v277_v14 = vrot.slane %v62_v12, %v268_v11 }
  0xc5   :  { %1156 = vmatprep.subr.bf16.mxu0 %v2894_v15 }
  0xc7   :  { %1709 = vmatpush1.bf16.msra.mxu1 %v2966_v52 }
  0xc8   :  { %1157 = vmatpush1.bf16.msra.mxu0 %v2892_v17  ;;  %1710 = vmatprep.subr.bf16.mxu1 %v2971_v53 }
  0xc9   :  { %1158 = vmatprep.subr.bf16.mxu0 %v2899_v18 }
  0xcb   :  { %1711 = vmatpush1.bf16.msra.mxu1 %v2969_v54 }
  0xcc   :  { %1159 = vmatpush1.bf16.msra.mxu0 %v2897_v19  ;;  %1712 = vmatprep.subr.bf16.mxu1 %v2974_v55 }
  0xcd   :  { %1160 = vmatprep.subr.bf16.mxu0 %v2904_v20 }
  0xcf   :  { %1713 = vmatpush1.bf16.msra.mxu1 %v2972_v56 }
  0xd0   :  { %1161 = vmatpush1.bf16.msra.mxu0 %v2902_v23  ;;  %v3015_v23 = vld [vmem:[#allocation5 + $0x6d8] ss:$12 sps:$4 sm:$0xff]  }
  0xd1   :  { %1162 = vmatprep.subr.bf16.mxu0 %v2909_v24  ;;  %v3016_v24 = vld [vmem:[#allocation5 + $0x7b0] ss:$12 sps:$4 sm:$0xff]  }
  0xd4   :  { %1163 = vmatpush1.bf16.msra.mxu0 %v2907_v25  ;;  %v3017_v25 = vld [vmem:[#allocation5 + $0x6f0] ss:$12 sps:$4 sm:$0xff]  }
  0xd5   :  { %1164 = vmatprep.subr.bf16.mxu0 %v2914_v26 }
  0xd8   :  { %1165 = vmatpush1.bf16.msra.mxu0 %v2912_v27  ;;  %v3018_v27 = vld [vmem:[#allocation5 + $0x7c8] ss:$12 sps:$4 sm:$0xff]  }
  0xd9   :  { %1166 = vmatprep.subr.bf16.mxu0 %v2919_v28 }
  0xdc   :  { %1167 = vmatpush1.bf16.msra.mxu0 %v2917_v29 }
  0xdd   :  { %1168 = vmatprep.subr.bf16.mxu0 %v2922_v30 }
  0xe0   :  { %1169 = vmatpush1.bf16.msra.mxu0 %v2920_v31 }
  0xe1   :  { %1170 = vmatprep.subr.bf16.mxu0 %v2926_v32  ;;  %v3019_v32 = vld [vmem:[#allocation5 + $0x708] ss:$12 sps:$4 sm:$0xff]  }
  0xe4   :  { %1171 = vmatpush1.bf16.msra.mxu0 %v2924_v33 }
  0xe5   :  { %1172 = vmatprep.subr.bf16.mxu0 %v2929_v34  ;;  %v3020_v34 = vld [vmem:[#allocation5 + $0x7e0] ss:$12 sps:$4 sm:$0xff]  }
  0xe8   :  { %1173 = vmatpush1.bf16.msra.mxu0 %v2927_v35  ;;  %v3021_v35 = vld [vmem:[#allocation5 + $0x720] ss:$12 sps:$4 sm:$0xff]  }
  0xe9   :  { %1174 = vmatprep.subr.bf16.mxu0 %v2932_v36 }
  0xec   :  { %1175 = vmatpush1.bf16.msra.mxu0 %v2930_v39 }
  0xed   :  { %1176 = vmatprep.subr.bf16.mxu0 %v2935_v40 }
  0xf0   :  { %1177 = vmatpush1.bf16.msra.mxu0 %v2933_v41 }
  0xf1   :  { %1178 = vmatprep.subr.bf16.mxu0 %v2938_v42  ;;  %v3023_v42 = vld [vmem:[#allocation5 + $0x738] ss:$12 sps:$4 sm:$0xff]  }
  0xf4   :  { %1179 = vmatpush1.bf16.msra.mxu0 %v2936_v43  ;;  %v3024_v43 = vld [vmem:[#allocation5 + $0x810] ss:$12 sps:$4 sm:$0xff]  }
  0xf5   :  { %1189 = vmatprep.subr.bf16.mxu0 %v2941_v44  ;;  %v3025_v44 = vld [vmem:[#allocation5 + $0x750] ss:$12 sps:$4 sm:$0xff]  }
  0xf7   :  { %1181 = vmatmul.mubr.bf16.vlgmr.msra.gmra.mrb[0].mxu0 %v3216_v57  ;;  %v2977_v57 = vld [vmem:[#allocation5 + $0x5a4] ss:$12 sps:$4 sm:$0xff]  }
  0xf8   :  { %1190 = vmatpush1.bf16.msra.mxu0 %v2939_v45  ;;  %1221 = vmatprep.mubr.bf16.mxu0 %v3155_v46  ;;  %v3234_v45 = vld [vmem:[#allocation7] sm:$0xff] }
  0xf9   :  { %1714 = vmatprep.subr.bf16.mxu1 %v2977_v57  ;;  %2602 = vmatprep.subr.bf16.mxu0 %v3014_v22  ;;  %v269_v48 = vrot.slane %v3234_v45, %v268_v11  ;;  %v3011_v11 = vld [vmem:[#allocation5 + $0x6c0] ss:$12 sps:$4 sm:$0xff]   ;;  %v3034_v22 = vld [vmem:[#allocation5 + $0x8b8] ss:$12 sps:$4 sm:$0xff]  }
  0xfa   :  { %1715 = vmatpush1.bf16.msra.mxu1 %v2975_v58 }
  0xfb   :  { %1716 = vmatprep.subr.bf16.mxu1 %v2980_v59  ;;  %v2990_v59 = vld [vmem:[#allocation5 + $0x618] ss:$12 sps:$4 sm:$0xff]  }
  0xfe   :  { %1717 = vmatpush1.bf16.msra.mxu1 %v2978_v60 }
  0xff   :  { %1718 = vmatprep.subr.bf16.mxu1 %v2983_v62  ;;  %v2995_v62 = vld [vmem:[#allocation5 + $0x634] ss:$12 sps:$4 sm:$0xff]  }
 0x102   :  { %1719 = vmatpush1.bf16.msra.mxu1 %v2981_v63  ;;  %v2993_v63 = vld [vmem:[#allocation5 + $0x630] ss:$12 sps:$4 sm:$0xff]  }
 0x103   :  { %2444 = vmatmul.mubr.msk.bf16.vlgmr.msra.gmra.mrb[0].mxu0 %vm1062_vm1, %v3222_v3  ;;  %1720 = vmatprep.subr.bf16.mxu1 %v2986_v6  ;;  %v3007_v6 = vld [vmem:[#allocation5 + $0x694] ss:$12 sps:$4 sm:$0xff]  }
 0x104   :  { %2603 = vmatpush3.bf16.msra.mxu0 %v3015_v23  ;;  %v3035_v23 = vld [vmem:[#allocation5 + $0x8d0] ss:$12 sps:$4 sm:$0xff]  }
 0x105   :  { %2604 = vmatprep.subr.bf16.mxu0 %v3016_v24  ;;  %v1446_v24 = vsub.s32 1, %v3231_v8 }
 0x106   :  { %1721 = vmatpush1.bf16.msra.mxu1 %v2984_v7  ;;  %v3005_v7 = vld [vmem:[#allocation5 + $0x690] ss:$12 sps:$4 sm:$0xff]  }
 0x107   :  { %1722 = vmatprep.subr.bf16.mxu1 %v2989_v9  ;;  %v3010_v9 = vld [vmem:[#allocation5 + $0x6ac] ss:$12 sps:$4 sm:$0xff]  }
 0x108   :  { %2605 = vmatpush3.bf16.msra.mxu0 %v3017_v25  ;;  %v1447_v25 = vrot.slane %v3234_v45, %v1446_v24 }
 0x109   :  { %2606 = vmatprep.subr.bf16.mxu0 %v3018_v27 }
 0x10a   :  { %1723 = vmatpush1.bf16.msra.mxu1 %v2987_v10  ;;  %v3013_v10 = vld [vmem:[#allocation5 + $0x6c4] ss:$12 sps:$4 sm:$0xff]  }
 0x10b   :  { %1733 = vmatprep.subr.bf16.mxu1 %v2992_v13 }
 0x10c   :  { %2607 = vmatpush3.bf16.msra.mxu0 %v3019_v32 }
 0x10d   :  { %2608 = vmatprep.subr.bf16.mxu0 %v3020_v34 }
 0x110   :  { %2609 = vmatpush3.bf16.msra.mxu0 %v3021_v35 }
 0x111   :  { %2610 = vmatprep.subr.bf16.mxu0 %v3022_v37  ;;  %v3036_v37 = vld [vmem:[#allocation5 + $0x8e8] ss:$12 sps:$4 sm:$0xff]  }
 0x114   :  { %2611 = vmatpush3.bf16.msra.mxu0 %v3023_v42  ;;  %v3041_v42 = vld [vmem:[#allocation5 + $0x960] ss:$12 sps:$4 sm:$0xff]  }
 0x115   :  { %2612 = vmatprep.subr.bf16.mxu0 %v3024_v43  ;;  %v3042_v43 = vld [vmem:[#allocation5 + $0x978] ss:$12 sps:$4 sm:$0xff]  }
 0x118   :  { %2613 = vmatpush3.bf16.msra.mxu0 %v3025_v44  ;;  %v3043_v44 = vld [vmem:[#allocation5 + $0x990] ss:$12 sps:$4 sm:$0xff]  }
 0x131   :  { %v2550_v0 = vpop.f32.mrb[0].mxu1 }
 0x132   :  { %v2551_v1 = vpop.f32.mrb[1].mxu1 }
 0x133   :  { %v2552_v2 = vadd.f32 %v2551_v1, %v2550_v0  ;;  %v2553_v3 = vpop.f32.mrb[2].mxu1  ;;  %v2998_v0 = vld [vmem:[#allocation5 + $0x64c] ss:$12 sps:$4 sm:$0xff]   ;;  %v2996_v1 = vld [vmem:[#allocation5 + $0x648] ss:$12 sps:$4 sm:$0xff]  }
 0x134   :  { %v2554_v4 = vpop.f32.mrb[3].mxu1  ;;  %v2999_v3 = vld [vmem:[#allocation5 + $0x660] ss:$12 sps:$4 sm:$0xff]  }
 0x135   :  { %v1265_v15 = vadd.f32 %v2552_v2, %v277_v14  ;;  %v3001_v2 = vld [vmem:[#allocation5 + $0x664] ss:$12 sps:$4 sm:$0xff]   ;;  %v3004_v4 = vld [vmem:[#allocation5 + $0x67c] ss:$12 sps:$4 sm:$0xff]  }
 0x136   :  { %v3026_v14 = vld [vmem:[#allocation5 + $0x828] ss:$12 sps:$4 sm:$0xff]  }
 0x137   :  { %2614 = vmatprep.subr.bf16.mxu0 %v3026_v14 }
 0x151   :  { %v2572_v16 = vpop.f32.mrb[4].mxu1 }
 0x152   :  { %v2573_v17 = vpop.f32.mrb[5].mxu1 }
 0x153   :  { %v2574_v18 = vadd.f32 %v2573_v17, %v2572_v16  ;;  %v2575_v19 = vpop.f32.mrb[6].mxu1  ;;  %v3028_v16 = vld [vmem:[#allocation5 + $0x840] ss:$12 sps:$4 sm:$0xff]  }
 0x154   :  { %v2576_v20 = vpop.f32.mrb[7].mxu1  ;;  %v3029_v17 = vld [vmem:[#allocation5 + $0x780] ss:$12 sps:$4 sm:$0xff]   ;;  %v3031_v19 = vld [vmem:[#allocation5 + $0x870] ss:$12 sps:$4 sm:$0xff]  }
 0x155   :  { %v1305_v21 = vadd.f32 %v2574_v18, %v1265_v15  ;;  %v3027_v15 = vld [vmem:[#allocation5 + $0x768] ss:$12 sps:$4 sm:$0xff]   ;;  %v3030_v18 = vld [vmem:[#allocation5 + $0x858] ss:$12 sps:$4 sm:$0xff]  }
 0x156   :  { %2615 = vmatpush3.bf16.msra.mxu0 %v3027_v15  ;;  %v3032_v20 = vld [vmem:[#allocation5 + $0x888] ss:$12 sps:$4 sm:$0xff]  }
 0x157   :  { %2616 = vmatprep.subr.bf16.mxu0 %v3028_v16 }
 0x15a   :  { %2617 = vmatpush3.bf16.msra.mxu0 %v3029_v17 }
 0x15b   :  { %2677 = vmatprep.subr.bf16.mxu0 %v3153_v61 }
 0x171   :  { %v2594_v26 = vpop.f32.mrb[8].mxu1 }
 0x172   :  { %v2595_v28 = vpop.f32.mrb[9].mxu1 }
 0x173   :  { %v2596_v29 = vadd.f32 %v2595_v28, %v2594_v26  ;;  %v2597_v30 = vpop.f32.mrb[10].mxu1  ;;  %v1451_v26 = vrot.slane %v3236_v47, %v1446_v24  ;;  %v1812_v47 = vsub.s32 2, %v3231_v8 }
 0x174   :  { %v2598_v31 = vpop.f32.mrb[11].mxu1 }
 0x175   :  { %v1345_v33 = vadd.f32 %v2596_v29, %v1305_v21  ;;  %v3033_v21 = vld [vmem:[#allocation5 + $0x8a0] ss:$12 sps:$4 sm:$0xff]  }
 0x179   :  { %v1384_v36 = vpop.f32.mrb[12].mxu1 }
 0x17a   :  { %v1385_v38 = vadd.f32 %v1384_v36, %v1345_v33  ;;  %v2655_v39 = vpop.f32.mrb[13].mxu1 }
 0x17b   :  { %v1387_v40 = vpop.f32.mrb[14].mxu1  ;;  %v3038_v39 = vld [vmem:[#allocation5 + $0x918] ss:$12 sps:$4 sm:$0xff]  }
 0x17c   :  { %v2656_v41 = vpop.f32.mrb[15].mxu1  ;;  %v1392_v12 = vmax.f32 %v1385_v38, 0.0  ;;  %v3037_v38 = vld [vmem:[#allocation5 + $0x900] ss:$12 sps:$4 sm:$0xff]   ;;  %v3039_v40 = vld [vmem:[#allocation5 + $0x930] ss:$12 sps:$4 sm:$0xff]  }
 0x17d   :  { %v3040_v41 = vld [vmem:[#allocation5 + $0x948] ss:$12 sps:$4 sm:$0xff]  }
 0x17e   :  { %v1443_v13 = vpack.c.bf16 %v1392_v12, %v1392_v12  ;;  %v3053_v12 = vld [vmem:[#allocation5 + $0xa80] ss:$12 sps:$4 sm:$0xff]  }
 0x1d6   :  { %v1223_v50 = vpop.f32.mrb[0].mxu0 }
 0x1d7   :  { %v2717_v51 = vadd.f32 %v1223_v50, %v269_v48  ;;  %v1225_v52 = vpop.f32.mrb[1].mxu0 }
 0x1d8   :  { %v2718_v53 = vadd.f32 %v1225_v52, %v273_v49  ;;  %v1227_v54 = vpop.f32.mrb[2].mxu0  ;;  %v1813_v49 = vrot.slane %v3234_v45, %v1812_v47 }
 0x1d9   :  { %v1390_v55 = vmax.f32 %v2717_v51, 0.0  ;;  %v1228_v56 = vpop.f32.mrb[3].mxu0 }
 0x1da   :  { %v1391_v57 = vmax.f32 %v2718_v53, 0.0 }
 0x1db   :  { %v1441_v60 = vpack.c.bf16 %v1390_v55, %v1390_v55 }
 0x1dc   :  { %v1442_v58 = vpack.c.bf16 %v1391_v57, %v1391_v57  ;;  %v3044_v57 = vld [vmem:[#allocation5 + $0x9a8] ss:$12 sps:$4 sm:$0xff]  }
 0x1de   :  { %1724 = vmatprep.mubr.bf16.mxu1 %v1442_v58  ;;  %v3045_v58 = vld [vmem:[#allocation5 + $0x9c0] ss:$12 sps:$4 sm:$0xff]  }
 0x1df   :  { %1725 = vmatmul.mubr.bf16.vlgmr.msra.gmra.mrb[16].mxu1 %v1441_v60  ;;  %v3047_v60 = vld [vmem:[#allocation5 + $0x9f0] ss:$12 sps:$4 sm:$0xff]  }
 0x1e0   :  { %1734 = vmatpush1.bf16.msra.mxu1 %v2990_v59  ;;  %1765 = vmatprep.mubr.bf16.mxu1 %v3155_v46  ;;  %v3008_v46 = vld [vmem:[#allocation5 + $0x6a8] ss:$12 sps:$4 sm:$0xff]   ;;  %v3046_v59 = vld [vmem:[#allocation5 + $0x9d8] ss:$12 sps:$4 sm:$0xff]  }
 0x1e1   :  { %1735 = vmatprep.subr.bf16.mxu1 %v2995_v62  ;;  %v3048_v62 = vld [vmem:[#allocation5 + $0xa08] ss:$12 sps:$4 sm:$0xff]  }
 0x1e4   :  { %1736 = vmatpush1.bf16.msra.mxu1 %v2993_v63  ;;  %v3049_v63 = vld [vmem:[#allocation5 + $0xa20] ss:$12 sps:$4 sm:$0xff]  }
 0x1e5   :  { %1737 = vmatprep.subr.bf16.mxu1 %v2998_v0  ;;  %v3050_v0 = vld [vmem:[#allocation5 + $0xa38] ss:$12 sps:$4 sm:$0xff]  }
 0x1e8   :  { %1738 = vmatpush1.bf16.msra.mxu1 %v2996_v1  ;;  %v3051_v1 = vld [vmem:[#allocation5 + $0xa50] ss:$12 sps:$4 sm:$0xff]  }
 0x1e9   :  { %1739 = vmatprep.subr.bf16.mxu1 %v3001_v2  ;;  %v1970_v2 = vsub.s32 3, %v3231_v8 }
 0x1ec   :  { %1740 = vmatpush1.bf16.msra.mxu1 %v2999_v3  ;;  %v1971_v3 = vrot.slane %v3234_v45, %v1970_v2 }
 0x1ed   :  { %1741 = vmatprep.subr.bf16.mxu1 %v3004_v4 }
 0x1f0   :  { %1742 = vmatpush1.bf16.msra.mxu1 %v3002_v5 }
 0x1f1   :  { %1743 = vmatprep.subr.bf16.mxu1 %v3007_v6 }
 0x1f4   :  { %1744 = vmatpush1.bf16.msra.mxu1 %v3005_v7 }
 0x1f5   :  { %1745 = vmatprep.subr.bf16.mxu1 %v3010_v9 }
 0x1f8   :  { %1746 = vmatpush1.bf16.msra.mxu1 %v3008_v46 }
 0x1f9   :  { %1747 = vmatprep.subr.bf16.mxu1 %v3013_v10 }
 0x1fc   :  { %1748 = vmatpush1.bf16.msra.mxu1 %v3011_v11  ;;  %v3052_v11 = vld [vmem:[#allocation5 + $0xa68] ss:$12 sps:$4 sm:$0xff]  }
 0x1fd   :  { %2657 = vmatprep.subr.bf16.mxu1 %v3153_v61 }
 0x1ff   :  { %1766 = vmatmul.mubr.bf16.vlgmr.msra.gmra.mrb[16].mxu1 %v1443_v13  ;;  %v2080_v13 = vsub.s32 4, %v3231_v8 }
 0x200   :  { %2673 = vmatprep.mubr.msk.bf16.mxu1 %vm3154_vm0, %v3153_v61  ;;  %2658 = vmatpush3.bf16.msra.mxu1 %v3030_v18 }
 0x201   :  { %2659 = vmatprep.subr.bf16.mxu1 %v3153_v61  ;;  %v2081_v14 = vrot.slane %v3234_v45, %v2080_v13 }
 0x204   :  { %2660 = vmatpush3.bf16.msra.mxu1 %v3031_v19 }
 0x205   :  { %2661 = vmatprep.subr.bf16.mxu1 %v3153_v61 }
 0x208   :  { %2662 = vmatpush3.bf16.msra.mxu1 %v3032_v20 }
 0x209   :  { %2663 = vmatprep.subr.bf16.mxu1 %v3153_v61 }
 0x20c   :  { %2664 = vmatpush3.bf16.msra.mxu1 %v3033_v21 }
 0x20d   :  { %2665 = vmatprep.subr.bf16.mxu1 %v3153_v61 }
 0x210   :  { %2666 = vmatpush3.bf16.msra.mxu1 %v3034_v22  ;;  %v2190_v22 = vsub.s32 5, %v3231_v8 }
 0x211   :  { %2667 = vmatprep.subr.bf16.mxu1 %v3153_v61 }
 0x214   :  { %2668 = vmatpush3.bf16.msra.mxu1 %v3035_v23  ;;  %v2191_v23 = vrot.slane %v3234_v45, %v2190_v22 }
 0x215   :  { %2669 = vmatprep.subr.bf16.mxu1 %v3153_v61 }
 0x218   :  { %2670 = vmatpush3.bf16.msra.mxu1 %v3036_v37 }
 0x219   :  { %2671 = vmatprep.subr.bf16.mxu1 %v3153_v61 }
 0x21c   :  { %2672 = vmatpush3.bf16.msra.mxu1 %v3037_v38 }
 0x21d   :  { %2697 = vmatprep.subr.bf16.mxu1 %v3153_v61 }
 0x2d2   :  { %v1767_v27 = vpop.f32.mrb[16].mxu1 }
 0x2d3   :  { %v2719_v28 = vadd.f32 %v1767_v27, %v1447_v25  ;;  %v1769_v29 = vpop.f32.mrb[17].mxu1 }
 0x2d4   :  { %v2720_v30 = vadd.f32 %v1769_v29, %v1451_v26  ;;  %v1771_v31 = vpop.f32.mrb[18].mxu1 }
 0x2d5   :  { %v1774_v32 = vmax.f32 %v2719_v28, 0.0  ;;  %v1772_v33 = vpop.f32.mrb[19].mxu1 }
 0x2d6   :  { %v1775_v34 = vmax.f32 %v2720_v30, 0.0 }
 0x2d7   :  { %v1808_v36 = vpack.c.bf16 %v1774_v32, %v1774_v32 }
 0x2d8   :  { %v1809_v35 = vpack.c.bf16 %v1775_v34, %v1775_v34 }
 0x2da   :  { %1942 = vmatprep.mubr.bf16.mxu0 %v1809_v35 }
 0x2db   :  { %1943 = vmatmul.mubr.bf16.vlgmr.msra.gmra.mrb[4].mxu0 %v1808_v36 }
 0x2dc   :  { %2693 = vmatprep.mubr.msk.bf16.mxu0 %vm3154_vm0, %v3153_v61  ;;  %2678 = vmatpush3.bf16.msra.mxu0 %v3038_v39 }
 0x2dd   :  { %2679 = vmatprep.subr.bf16.mxu0 %v3153_v61 }
 0x2e0   :  { %2680 = vmatpush3.bf16.msra.mxu0 %v3039_v40 }
 0x2e1   :  { %2681 = vmatprep.subr.bf16.mxu0 %v3153_v61 }
 0x2e4   :  { %2682 = vmatpush3.bf16.msra.mxu0 %v3040_v41 }
 0x2e5   :  { %2683 = vmatprep.subr.bf16.mxu0 %v3153_v61 }
 0x2e8   :  { %2684 = vmatpush3.bf16.msra.mxu0 %v3041_v42 }
 0x2e9   :  { %2685 = vmatprep.subr.bf16.mxu0 %v3153_v61 }
 0x2ec   :  { %2686 = vmatpush3.bf16.msra.mxu0 %v3042_v43 }
 0x2ed   :  { %2687 = vmatprep.subr.bf16.mxu0 %v3153_v61 }
 0x2f0   :  { %2688 = vmatpush3.bf16.msra.mxu0 %v3043_v44 }
 0x2f1   :  { %2689 = vmatprep.subr.bf16.mxu0 %v3153_v61 }
 0x2f4   :  { %2690 = vmatpush3.bf16.msra.mxu0 %v3044_v57 }
 0x2f5   :  { %2691 = vmatprep.subr.bf16.mxu0 %v3153_v61 }
 0x2f8   :  { %2692 = vmatpush3.bf16.msra.mxu0 %v3045_v58 }
 0x3ae   :  { %v2618_v48 = vpop.f32.mrb[4].mxu0 }
 0x3af   :  { %v2619_v50 = vpop.f32.mrb[5].mxu0 }
 0x3b0   :  { %v2620_v51 = vadd.f32 %v2619_v50, %v2618_v48  ;;  %v2621_v52 = vpop.f32.mrb[6].mxu0 }
 0x3b1   :  { %v2622_v53 = vpop.f32.mrb[7].mxu0 }
 0x3b2   :  { %v1945_v54 = vadd.f32 %v2620_v51, %v1813_v49 }
 0x3b4   :  { %v1950_v55 = vmax.f32 %v1945_v54, 0.0 }
 0x3b6   :  { %v1967_v56 = vpack.c.bf16 %v1950_v55, %v1950_v55 }
 0x3b8   :  { %2674 = vmatmul.mubr.bf16.vlgmr.msra.gmra.mrb[20].mxu1 %v1967_v56 }
 0x3b9   :  { %2713 = vmatprep.mubr.msk.bf16.mxu1 %vm3154_vm0, %v3153_v61  ;;  %2698 = vmatpush3.bf16.msra.mxu1 %v3046_v59 }
 0x3ba   :  { %2699 = vmatprep.subr.bf16.mxu1 %v3153_v61 }
 0x3bd   :  { %2700 = vmatpush3.bf16.msra.mxu1 %v3047_v60 }
 0x3be   :  { %2701 = vmatprep.subr.bf16.mxu1 %v3153_v61 }
 0x3c1   :  { %2702 = vmatpush3.bf16.msra.mxu1 %v3048_v62 }
 0x3c2   :  { %2703 = vmatprep.subr.bf16.mxu1 %v3153_v61 }
 0x3c5   :  { %2704 = vmatpush3.bf16.msra.mxu1 %v3049_v63 }
 0x3c6   :  { %2705 = vmatprep.subr.bf16.mxu1 %v3153_v61 }
 0x3c9   :  { %2706 = vmatpush3.bf16.msra.mxu1 %v3050_v0 }
 0x3ca   :  { %2707 = vmatprep.subr.bf16.mxu1 %v3153_v61 }
 0x3cd   :  { %2708 = vmatpush3.bf16.msra.mxu1 %v3051_v1 }
 0x3ce   :  { %2709 = vmatprep.subr.bf16.mxu1 %v3153_v61 }
 0x3d1   :  { %2710 = vmatpush3.bf16.msra.mxu1 %v3052_v11 }
 0x3d2   :  { %2711 = vmatprep.subr.bf16.mxu1 %v3153_v61 }
 0x3d5   :  { %2712 = vmatpush3.bf16.msra.mxu1 %v3053_v12 }
 0x48b   :  { %v2054_v4 = vpop.f32.mrb[20].mxu1 }
 0x48c   :  { %v2055_v5 = vadd.f32 %v2054_v4, %v1971_v3  ;;  %v2675_v6 = vpop.f32.mrb[21].mxu1 }
 0x48d   :  { %v2057_v7 = vpop.f32.mrb[22].mxu1 }
 0x48e   :  { %v2060_v9 = vmax.f32 %v2055_v5, 0.0  ;;  %v2676_v46 = vpop.f32.mrb[23].mxu1 }
 0x490   :  { %v2077_v10 = vpack.c.bf16 %v2060_v9, %v2060_v9 }
 0x492   :  { %2694 = vmatmul.mubr.bf16.vlgmr.msra.gmra.mrb[8].mxu0 %v2077_v10 }
 0x565   :  { %v2164_v15 = vpop.f32.mrb[8].mxu0 }
 0x566   :  { %v2165_v16 = vadd.f32 %v2164_v15, %v2081_v14  ;;  %v2695_v17 = vpop.f32.mrb[9].mxu0 }
 0x567   :  { %v2167_v18 = vpop.f32.mrb[10].mxu0 }
 0x568   :  { %v2170_v19 = vmax.f32 %v2165_v16, 0.0  ;;  %v2696_v20 = vpop.f32.mrb[11].mxu0 }
 0x56a   :  { %v2187_v21 = vpack.c.bf16 %v2170_v19, %v2170_v19 }
 0x56c   :  { %2714 = vmatmul.mubr.bf16.vlgmr.msra.gmra.mrb[24].mxu1 %v2187_v21 }
 0x63f   :  { %v2274_v61 = vpop.f32.mrb[24].mxu1 }
 0x640   :  { %v2275_v24 = vadd.f32 %v2274_v61, %v2191_v23  ;;  %v2715_v25 = vpop.f32.mrb[25].mxu1 }
 0x641   :  { %v2277_v26 = vpop.f32.mrb[26].mxu1 }
 0x642   :  { %2280 = vst [vmem:[#allocation8] sm:$0xff] %v2275_v24  ;;  %v2716_v27 = vpop.f32.mrb[27].mxu1 }
 0x643   :  { %3131 = shalt.err (!%p3128_p0)
}
 0x644   :  { %s3132_s25 = scalar_lea.hbm %s3297_s3, 128 }
 0x645   :  { %p3133_p1 = scmp.ne.s32.totalorder %s3297_s3, %s3132_s25  ;;  %p3136_p2 = scmp.lt.u32.totalorder %s3132_s25, %s3297_s3 }
 0x647   :  { %p3138_p3 = pnand %p3136_p2, %p3133_p1 }
 0x649   :  { %3141 = shalt.err (!%p3138_p3)
}
 0x64a   :  { %2290 = dma.vmem_to_hbm [thread:$0]  %s2288_s21, 128, %s3297_s3, [#allocation4]  }
 0x64b   :  { %3146 = dma.done.wait [#allocation4], 128  }
 0x64c   :  { %3147 = vsyncadd [#allocation4], 4294967168 }
 0x64d   :  { %2294 = vsyncpa [#allocation3], 1 }
 0x64e   :  { %2295 = vsyncpa [#allocation6], 1 }
 0x64f   :  { %2296 = vsyncpa [#allocation4], 1 }

</bundles_post_ra>
